<compile_context>
chip_gen: v5e
topology: v5e:2x2
jax: 0.10.0
libtpu: 0.0.40
codegen_flags: <defaults>
</compile_context>

<pallas_src>
import functools
import math

import jax
import jax.numpy as jnp
from jax.experimental import pallas as pl
from jax.experimental.pallas import tpu as pltpu


def _round_up(x, m):
    return (x + m - 1) // m * m


def _vmem_budget():
    """~75% of physical VMEM: ~96 MiB on v5e/v6e (128 MiB), ~48 MiB on v7x."""
    cap = None
    try:
        cap = int(pltpu.get_tpu_info().vmem_capacity_bytes)
    except Exception:
        cap = None
    if not cap or cap <= 0:
        cap = 64 * 1024 * 1024  # conservative fallback (safe on every chip)
    return (cap * 3) // 4


# ---------------------------------------------------------------------------
# Kernel
# ---------------------------------------------------------------------------
def _patch_mlp_kernel(x_ref, g_ref, b_ref, w1_ref, b1_ref, w2_ref, b2_ref,
                      o_ref, xn_ref, acc_ref, *, eps, exact_gelu):
    k = pl.program_id(1)
    nk = pl.num_programs(1)

    # ---- LayerNorm (f32) once per row block; cache the bf16 result ----
    @pl.when(k == 0)
    def _():
        x = x_ref[...].astype(jnp.float32)
        mean = jnp.mean(x, axis=-1, keepdims=True)
        xc = x - mean
        var = jnp.mean(xc * xc, axis=-1, keepdims=True)
        xn = xc * jax.lax.rsqrt(var + eps)
        xn = xn * g_ref[...] + b_ref[...]
        xn_ref[...] = xn.astype(jnp.bfloat16)
        acc_ref[...] = jnp.zeros_like(acc_ref)

    # ---- Linear1 on the MXU (bf16 in, f32 acc) + bias + GELU ----
    h = jnp.dot(xn_ref[...], w1_ref[...],
                preferred_element_type=jnp.float32) + b1_ref[...]
    if exact_gelu:
        h = 0.5 * h * (1.0 + jax.lax.erf(h * (1.0 / math.sqrt(2.0))))
    else:
        c = math.sqrt(2.0 / math.pi)
        h = 0.5 * h * (1.0 + jnp.tanh(c * (h + 0.044715 * h * h * h)))

    # TODO(synk): Dropout is identity at p=0 (module default) / eval; training
    # dropout with p>0 is not implemented in-kernel.

    # ---- Linear2 on the MXU, accumulate over hidden chunks in f32 ----
    acc_ref[...] += jnp.dot(h.astype(jnp.bfloat16), w2_ref[...],
                            preferred_element_type=jnp.float32)

    @pl.when(k == nk - 1)
    def _():
        o_ref[...] = (acc_ref[...] + b2_ref[...]).astype(o_ref.dtype)


# ---------------------------------------------------------------------------
# One-time parameter preparation (hoisted out of the per-call hot path)
# ---------------------------------------------------------------------------
def prepare_patch_mlp_params(gamma, beta, w1, b1, w2, b2, *, tk_h=None):
    """Transpose / zero-pad / bf16-cast the weights once.

    gamma, beta: (D,)      LayerNorm affine
    w1: (H, D), b1: (H,)   first nn.Linear (PyTorch layout)
    w2: (P, H), b2: (P,)   second nn.Linear
    tk_h: optional hidden-axis tile override (multiple of 128).
    """
    H, D = w1.shape
    P = w2.shape[0]
    Hp = _round_up(H, 128)
    Pp = _round_up(P, 128)

    if tk_h is None:
        budget = _vmem_budget()
        resident_bytes = (D * Hp + Hp * Pp) * 2 + Hp * 4 + (2 * D + Pp) * 4
        if resident_bytes <= budget // 2:
            tk_h = Hp                     # both weight matrices stay resident
        else:
            tk_h = 512                    # stream hidden-dim chunks
            while tk_h > 128 and 2 * ((D + Pp) * tk_h * 2 + tk_h * 4) > budget // 2:
                tk_h //= 2
    tk_h = max(128, _round_up(int(tk_h), 128))
    tk_h = min(tk_h, _round_up(Hp, tk_h))
    Hp = _round_up(Hp, tk_h)              # make the hidden tile divide Hp

    w1t = jnp.pad(jnp.transpose(w1), ((0, 0), (0, Hp - H))).astype(jnp.bfloat16)
    b1p = jnp.pad(b1, (0, Hp - H)).reshape(1, Hp).astype(jnp.float32)
    w2t = jnp.pad(jnp.transpose(w2),
                  ((0, Hp - H), (0, Pp - P))).astype(jnp.bfloat16)
    b2p = jnp.pad(b2, (0, Pp - P)).reshape(1, Pp).astype(jnp.float32)

    return {
        "gamma": gamma.reshape(1, D).astype(jnp.float32),
        "beta": beta.reshape(1, D).astype(jnp.float32),
        "w1t": w1t, "b1": b1p, "w2t": w2t, "b2": b2p,
        "piece_dim": int(P), "tk_h": int(tk_h),
    }


# ---------------------------------------------------------------------------
# Row-tile / VMEM planning (static, outside jit)
# ---------------------------------------------------------------------------
def _plan_row_tile(M, D, Hp, Pp, tk_h, x_itemsize, tm_hint=None):
    budget = _vmem_budget()
    resident = (tk_h == Hp)
    nbuf = 1 if resident else 2
    w_bytes = nbuf * (D * tk_h * 2 + tk_h * Pp * 2 + tk_h * 4) + (2 * D + Pp) * 4

    def act_bytes(tm):
        return (2 * tm * D * 4                 # x tile, double-buffered f32
                + 2 * tm * Pp * x_itemsize     # out tile, double-buffered
                + tm * Pp * 4                  # f32 accumulator scratch
                + tm * D * 2                   # bf16 LayerNorm cache scratch
                + tm * tk_h * 4)               # f32 hidden temp headroom

    if tm_hint is not None:
        tm = _round_up(max(int(tm_hint), 8), 8)
    else:
        tm = 512
        while tm > 8 and w_bytes + act_bytes(tm) > budget:
            tm //= 2
        tm = max(tm, 8)

    tm = min(tm, _round_up(M, 8))
    # Guarantee >= 2 row-grid steps so v7x megacore shards work across both TCs.
    if M > 8 and _round_up(M, 8) <= tm:
        tm = _round_up(-(-_round_up(M, 8) // 2), 8)
    tm = max(8, _round_up(tm, 8))
    return tm, budget


# ---------------------------------------------------------------------------
# pallas_call wrapper
# ---------------------------------------------------------------------------
def _spec(shape, index_map, mode=None):
    if mode is None:
        return pl.BlockSpec(shape, index_map)
    return pl.BlockSpec(shape, index_map, pipeline_mode=mode)


@functools.partial(
    jax.jit,
    static_argnames=("eps", "tm", "tk_h", "piece_dim", "vmem_limit_bytes",
                     "exact_gelu"))
def _patch_mlp_call(x, g, b, w1t, b1, w2t, b2, *, eps, tm, tk_h, piece_dim,
                    vmem_limit_bytes, exact_gelu):
    D = x.shape[-1]
    lead = x.shape[:-1]
    x2d = x.reshape(-1, D)
    M = x2d.shape[0]
    Hp = w1t.shape[1]
    Pp = w2t.shape[1]

    Mp = _round_up(M, tm)
    x_p = jnp.pad(x2d, ((0, Mp - M), (0, 0))) if Mp != M else x2d

    nk = Hp // tk_h
    n_row_tiles = Mp // tm
    resident = (nk == 1)

    const_mode = pl.Buffered(1)                      # fetched once, stays put
    w_mode = pl.Buffered(1) if resident else None    # stream -> keep 2 buffers

    grid = (n_row_tiles, nk)

    flops = 2 * Mp * (D * Hp + Hp * Pp)
    w_read_mult = 1 if resident else n_row_tiles
    bytes_accessed = (Mp * D * x_p.dtype.itemsize
                      + w_read_mult * ((D * Hp + Hp * Pp) * 2 + Hp * 4)
                      + (2 * D + Pp) * 4
                      + Mp * Pp * x_p.dtype.itemsize)

    y_p = pl.pallas_call(
        functools.partial(_patch_mlp_kernel, eps=float(eps),
                          exact_gelu=exact_gelu),
        out_shape=jax.ShapeDtypeStruct((Mp, Pp), x.dtype),
        grid_spec=pltpu.PrefetchScalarGridSpec(
            num_scalar_prefetch=0,
            grid=grid,
            in_specs=[
                _spec((tm, D), lambda i, k: (i, 0)),                    # x rows
                _spec((1, D), lambda i, k: (0, 0), const_mode),         # gamma
                _spec((1, D), lambda i, k: (0, 0), const_mode),         # beta
                _spec((D, tk_h), lambda i, k: (0, k), w_mode),          # W1^T
                _spec((1, tk_h), lambda i, k: (0, k), w_mode),          # b1
                _spec((tk_h, Pp), lambda i, k: (k, 0), w_mode),         # W2^T
                _spec((1, Pp), lambda i, k: (0, 0), const_mode),        # b2
            ],
            out_specs=pl.BlockSpec((tm, Pp), lambda i, k: (i, 0)),
            scratch_shapes=[
                pltpu.VMEM((tm, D), jnp.bfloat16),    # cached LayerNorm output
                pltpu.VMEM((tm, Pp), jnp.float32),    # second-matmul accumulator
            ],
        ),
        compiler_params=pltpu.CompilerParams(
            dimension_semantics=("parallel", "arbitrary"),
            vmem_limit_bytes=int(vmem_limit_bytes),
        ),
        cost_estimate=pl.CostEstimate(
            flops=flops,
            transcendentals=Mp * Hp,
            bytes_accessed=bytes_accessed,
        ),
    )(x_p, g, b, w1t, b1, w2t, b2)

    y = y_p[:M, :piece_dim]
    return y.reshape(*lead, piece_dim)


def patch_mlp_forward(x, params, *, eps=1e-5, tm=None, exact_gelu=True):
    """Fused _PatchMLP forward. `params` comes from prepare_patch_mlp_params."""
    D = params["gamma"].shape[-1]
    Hp = params["w1t"].shape[-1]
    Pp = params["w2t"].shape[-1]
    tk_h = params["tk_h"]
    M = math.prod(x.shape[:-1]) if x.ndim > 1 else 1
    tm_sel, vmem_limit = _plan_row_tile(M, D, Hp, Pp, tk_h,
                                        jnp.dtype(x.dtype).itemsize, tm_hint=tm)
    return _patch_mlp_call(
        x, params["gamma"], params["beta"], params["w1t"], params["b1"],
        params["w2t"], params["b2"],
        eps=float(eps), tm=tm_sel, tk_h=tk_h, piece_dim=params["piece_dim"],
        vmem_limit_bytes=vmem_limit, exact_gelu=bool(exact_gelu))


# ---------------------------------------------------------------------------
# Pure-JAX reference (same bf16 MXU casts as the kernel)
# ---------------------------------------------------------------------------
def _reference_forward(x, gamma, beta, w1, b1, w2, b2, eps=1e-5):
    mean = jnp.mean(x, axis=-1, keepdims=True)
    xc = x - mean
    var = jnp.mean(xc * xc, axis=-1, keepdims=True)
    xn = xc * jax.lax.rsqrt(var + eps) * gamma + beta
    h = jnp.dot(xn.astype(jnp.bfloat16), jnp.transpose(w1).astype(jnp.bfloat16),
                preferred_element_type=jnp.float32) + b1
    h = 0.5 * h * (1.0 + jax.lax.erf(h * (1.0 / math.sqrt(2.0))))
    y = jnp.dot(h.astype(jnp.bfloat16), jnp.transpose(w2).astype(jnp.bfloat16),
                preferred_element_type=jnp.float32) + b2
    return y


if __name__ == "__main__":
    key = jax.random.PRNGKey(0)

    def make_params(k, text_dim, hidden, piece_dim):
        kg, kb, kw1, kb1, kw2, kb2 = jax.random.split(k, 6)
        gamma = 1.0 + 0.1 * jax.random.normal(kg, (text_dim,), jnp.float32)
        beta = 0.1 * jax.random.normal(kb, (text_dim,), jnp.float32)
        bd1 = 1.0 / math.sqrt(text_dim)
        w1 = jax.random.uniform(kw1, (hidden, text_dim), jnp.float32, -bd1, bd1)
        b1 = jax.random.uniform(kb1, (hidden,), jnp.float32, -bd1, bd1)
        bd2 = 1.0 / math.sqrt(hidden)
        w2 = jax.random.uniform(kw2, (piece_dim, hidden), jnp.float32, -bd2, bd2)
        b2 = jax.random.uniform(kb2, (piece_dim,), jnp.float32, -bd2, bd2)
        return gamma, beta, w1, b1, w2, b2

    k1, k2, kx1, kx2 = jax.random.split(key, 4)

    # --- Test 1: module-sized config; resident weights, 2-step row grid ---
    B, N, text_dim, piece_dim = 2, 16, 32, 48
    hidden = int(text_dim * 2.0)
    gamma, beta, w1, b1, w2, b2 = make_params(k1, text_dim, hidden, piece_dim)
    x = jax.random.normal(kx1, (B, N, text_dim), jnp.float32)
    params = prepare_patch_mlp_params(gamma, beta, w1, b1, w2, b2)
    out = jax.block_until_ready(patch_mlp_forward(x, params))
    ref = _reference_forward(x, gamma, beta, w1, b1, w2, b2)
    assert out.shape == (B, N, piece_dim), out.shape
    err1 = float(jnp.max(jnp.abs(out - ref)))
    assert jnp.allclose(out, ref, atol=5e-3, rtol=5e-3), err1

    # --- Test 2: force the hidden-axis streaming path (tk_h < Hp) ---
    B2, N2, D2, H2, P2 = 2, 8, 64, 512, 40
    gamma2, beta2, w1_2, b1_2, w2_2, b2_2 = make_params(k2, D2, H2, P2)
    x2 = jax.random.normal(kx2, (B2, N2, D2), jnp.float32)
    params2 = prepare_patch_mlp_params(gamma2, beta2, w1_2, b1_2, w2_2, b2_2,
                                       tk_h=128)
    out2 = jax.block_until_ready(patch_mlp_forward(x2, params2))
    ref2 = _reference_forward(x2, gamma2, beta2, w1_2, b1_2, w2_2, b2_2)
    assert out2.shape == (B2, N2, P2), out2.shape
    err2 = float(jnp.max(jnp.abs(out2 - ref2)))
    assert jnp.allclose(out2, ref2, atol=5e-3, rtol=5e-3), err2

    print("KERNEL_OK")
</pallas_src>

<mosaic_0001>
module attributes {stable_mosaic.version = 11 : i64} {
  func.func @_patch_mlp_kernel(%arg0: i32, %arg1: i32, %arg2: memref<16x32xf32, #tpu.memory_space<vmem>>, %arg3: memref<1x32xf32, #tpu.memory_space<vmem>>, %arg4: memref<1x32xf32, #tpu.memory_space<vmem>>, %arg5: memref<32x128xbf16, #tpu.memory_space<vmem>>, %arg6: memref<1x128xf32, #tpu.memory_space<vmem>>, %arg7: memref<128x128xbf16, #tpu.memory_space<vmem>>, %arg8: memref<1x128xf32, #tpu.memory_space<vmem>>, %arg9: memref<16x128xf32, #tpu.memory_space<vmem>>, %arg10: memref<16x32xbf16, #tpu.memory_space<vmem>>, %arg11: memref<16x128xf32, #tpu.memory_space<vmem>>) attributes {dimension_semantics = [#tpu.dimension_semantics<parallel>, #tpu.dimension_semantics<arbitrary>], iteration_bounds = array<i64: 2, 1>, scalar_prefetch = 0 : i64, scratch_operands = 2 : i64, tpu.core_type = #tpu.core_type<tc>, window_params = [{transform_indices = @transform_0, window_bounds = array<i64: 16, 32>}, {pipeline_mode = #tpu.pipeline_mode<synchronous>, transform_indices = @transform_1, window_bounds = array<i64: 1, 32>}, {pipeline_mode = #tpu.pipeline_mode<synchronous>, transform_indices = @transform_2, window_bounds = array<i64: 1, 32>}, {pipeline_mode = #tpu.pipeline_mode<synchronous>, transform_indices = @transform_3, window_bounds = array<i64: 32, 128>}, {pipeline_mode = #tpu.pipeline_mode<synchronous>, transform_indices = @transform_4, window_bounds = array<i64: 1, 128>}, {pipeline_mode = #tpu.pipeline_mode<synchronous>, transform_indices = @transform_5, window_bounds = array<i64: 128, 128>}, {pipeline_mode = #tpu.pipeline_mode<synchronous>, transform_indices = @transform_6, window_bounds = array<i64: 1, 128>}, {transform_indices = @transform_7, window_bounds = array<i64: 16, 128>}]} {
    %c0_i32 = arith.constant 0 : i32
    %0 = arith.cmpi eq, %arg1, %c0_i32 : i32
    %1 = arith.extui %0 : i1 to i32
    %c0_i32_0 = arith.constant 0 : i32
    %2 = arith.cmpi ne, %1, %c0_i32_0 : i32
    scf.if %2 {
      %c0_18 = arith.constant 0 : index
      %c0_19 = arith.constant 0 : index
      %26 = vector.load %arg2[%c0_18, %c0_19] : memref<16x32xf32, #tpu.memory_space<vmem>>, vector<16x32xf32>
      %cst_20 = arith.constant dense<0.000000e+00> : vector<16xf32>
      %27 = vector.multi_reduction <add>, %26, %cst_20 [1] : vector<16x32xf32> to vector<16xf32>
      %28 = vector.shape_cast %27 : vector<16xf32> to vector<16x1xf32>
      %cst_21 = arith.constant 3.200000e+01 : f32
      %29 = vector.broadcast %cst_21 : f32 to vector<16x1xf32>
      %30 = arith.divf %28, %29 : vector<16x1xf32>
      %31 = vector.broadcast %30 : vector<16x1xf32> to vector<16x32xf32>
      %32 = arith.subf %26, %31 : vector<16x32xf32>
      %33 = arith.mulf %32, %32 : vector<16x32xf32>
      %cst_22 = arith.constant dense<0.000000e+00> : vector<16xf32>
      %34 = vector.multi_reduction <add>, %33, %cst_22 [1] : vector<16x32xf32> to vector<16xf32>
      %35 = vector.shape_cast %34 : vector<16xf32> to vector<16x1xf32>
      %cst_23 = arith.constant 3.200000e+01 : f32
      %36 = vector.broadcast %cst_23 : f32 to vector<16x1xf32>
      %37 = arith.divf %35, %36 : vector<16x1xf32>
      %cst_24 = arith.constant 9.99999974E-6 : f32
      %38 = vector.broadcast %cst_24 : f32 to vector<16x1xf32>
      %39 = arith.addf %37, %38 : vector<16x1xf32>
      %40 = math.rsqrt %39 : vector<16x1xf32>
      %41 = vector.broadcast %40 : vector<16x1xf32> to vector<16x32xf32>
      %42 = arith.mulf %32, %41 : vector<16x32xf32>
      %c0_25 = arith.constant 0 : index
      %c0_26 = arith.constant 0 : index
      %43 = vector.load %arg3[%c0_25, %c0_26] : memref<1x32xf32, #tpu.memory_space<vmem>>, vector<1x32xf32>
      %44 = vector.broadcast %43 : vector<1x32xf32> to vector<16x32xf32>
      %45 = arith.mulf %42, %44 : vector<16x32xf32>
      %c0_27 = arith.constant 0 : index
      %c0_28 = arith.constant 0 : index
      %46 = vector.load %arg4[%c0_27, %c0_28] : memref<1x32xf32, #tpu.memory_space<vmem>>, vector<1x32xf32>
      %47 = vector.broadcast %46 : vector<1x32xf32> to vector<16x32xf32>
      %48 = arith.addf %45, %47 : vector<16x32xf32>
      %49 = arith.truncf %48 : vector<16x32xf32> to vector<16x32xbf16>
      %c0_29 = arith.constant 0 : index
      %c0_30 = arith.constant 0 : index
      %50 = vector.load %arg10[%c0_29, %c0_30] : memref<16x32xbf16, #tpu.memory_space<vmem>>, vector<16x32xbf16>
      tpu.vector_store %arg10[%c0_29, %c0_30], %49 {strides = array<i32>} : memref<16x32xbf16, #tpu.memory_space<vmem>>, vector<16x32xbf16>,
      %cst_31 = arith.constant 0.000000e+00 : f32
      %51 = vector.broadcast %cst_31 : f32 to vector<16x128xf32>
      %c0_32 = arith.constant 0 : index
      %c0_33 = arith.constant 0 : index
      %52 = vector.load %arg11[%c0_32, %c0_33] : memref<16x128xf32, #tpu.memory_space<vmem>>, vector<16x128xf32>
      tpu.vector_store %arg11[%c0_32, %c0_33], %51 {strides = array<i32>} : memref<16x128xf32, #tpu.memory_space<vmem>>, vector<16x128xf32>,
    } else {
    }
    %c0 = arith.constant 0 : index
    %c0_1 = arith.constant 0 : index
    %3 = vector.load %arg10[%c0, %c0_1] : memref<16x32xbf16, #tpu.memory_space<vmem>>, vector<16x32xbf16>
    %c0_2 = arith.constant 0 : index
    %c0_3 = arith.constant 0 : index
    %4 = vector.load %arg5[%c0_2, %c0_3] : memref<32x128xbf16, #tpu.memory_space<vmem>>, vector<32x128xbf16>
    %cst = arith.constant dense<0.000000e+00> : vector<16x128xf32>
    %5 = tpu.matmul %3, %4, %cst {dimension_numbers = #tpu.dot_dimension_numbers<[1], [0], [0], [1], [0, 0, 1, 1], [], []>} : vector<16x32xbf16>, vector<32x128xbf16>, vector<16x128xf32> -> vector<16x128xf32>
    %c0_4 = arith.constant 0 : index
    %c0_5 = arith.constant 0 : index
    %6 = vector.load %arg6[%c0_4, %c0_5] : memref<1x128xf32, #tpu.memory_space<vmem>>, vector<1x128xf32>
    %7 = vector.broadcast %6 : vector<1x128xf32> to vector<16x128xf32>
    %8 = arith.addf %5, %7 : vector<16x128xf32>
    %cst_6 = arith.constant 5.000000e-01 : f32
    %9 = vector.broadcast %cst_6 : f32 to vector<16x128xf32>
    %10 = arith.mulf %9, %8 : vector<16x128xf32>
    %cst_7 = arith.constant 0.707106769 : f32
    %11 = vector.broadcast %cst_7 : f32 to vector<16x128xf32>
    %12 = arith.mulf %8, %11 : vector<16x128xf32>
    %13 = math.erf %12 : vector<16x128xf32>
    %cst_8 = arith.constant 1.000000e+00 : f32
    %14 = vector.broadcast %cst_8 : f32 to vector<16x128xf32>
    %15 = arith.addf %14, %13 : vector<16x128xf32>
    %16 = arith.mulf %10, %15 : vector<16x128xf32>
    %c0_9 = arith.constant 0 : index
    %c0_10 = arith.constant 0 : index
    %17 = vector.load %arg11[%c0_9, %c0_10] : memref<16x128xf32, #tpu.memory_space<vmem>>, vector<16x128xf32>
    %18 = arith.truncf %16 : vector<16x128xf32> to vector<16x128xbf16>
    %c0_11 = arith.constant 0 : index
    %c0_12 = arith.constant 0 : index
    %19 = vector.load %arg7[%c0_11, %c0_12] : memref<128x128xbf16, #tpu.memory_space<vmem>>, vector<128x128xbf16>
    %cst_13 = arith.constant dense<0.000000e+00> : vector<16x128xf32>
    %20 = tpu.matmul %18, %19, %cst_13 {dimension_numbers = #tpu.dot_dimension_numbers<[1], [0], [0], [1], [0, 0, 1, 1], [], []>} : vector<16x128xbf16>, vector<128x128xbf16>, vector<16x128xf32> -> vector<16x128xf32>
    %21 = arith.addf %17, %20 : vector<16x128xf32>
    %c0_14 = arith.constant 0 : index
    %c0_15 = arith.constant 0 : index
    %22 = vector.load %arg11[%c0_14, %c0_15] : memref<16x128xf32, #tpu.memory_space<vmem>>, vector<16x128xf32>
    tpu.vector_store %arg11[%c0_14, %c0_15], %21 {strides = array<i32>} : memref<16x128xf32, #tpu.memory_space<vmem>>, vector<16x128xf32>,
    %c0_i32_16 = arith.constant 0 : i32
    %23 = arith.cmpi eq, %arg1, %c0_i32_16 : i32
    %24 = arith.extui %23 : i1 to i32
    %c0_i32_17 = arith.constant 0 : i32
    %25 = arith.cmpi ne, %24, %c0_i32_17 : i32
    scf.if %25 {
      %c0_18 = arith.constant 0 : index
      %c0_19 = arith.constant 0 : index
      %26 = vector.load %arg11[%c0_18, %c0_19] : memref<16x128xf32, #tpu.memory_space<vmem>>, vector<16x128xf32>
      %c0_20 = arith.constant 0 : index
      %c0_21 = arith.constant 0 : index
      %27 = vector.load %arg8[%c0_20, %c0_21] : memref<1x128xf32, #tpu.memory_space<vmem>>, vector<1x128xf32>
      %28 = vector.broadcast %27 : vector<1x128xf32> to vector<16x128xf32>
      %29 = arith.addf %26, %28 : vector<16x128xf32>
      %c0_22 = arith.constant 0 : index
      %c0_23 = arith.constant 0 : index
      %30 = vector.load %arg9[%c0_22, %c0_23] : memref<16x128xf32, #tpu.memory_space<vmem>>, vector<16x128xf32>
      tpu.vector_store %arg9[%c0_22, %c0_23], %29 {strides = array<i32>} : memref<16x128xf32, #tpu.memory_space<vmem>>, vector<16x128xf32>,
    } else {
    }
    return
  }
  func.func @transform_0(%arg0: i32, %arg1: i32) -> (i32, i32) {
    %c0_i32 = arith.constant 0 : i32
    %c0_i32_0 = arith.constant 0 : i32
    return %arg0, %c0_i32 : i32, i32
  }
  func.func @transform_1(%arg0: i32, %arg1: i32) -> (i32, i32) {
    %c0_i32 = arith.constant 0 : i32
    %c0_i32_0 = arith.constant 0 : i32
    %c0_i32_1 = arith.constant 0 : i32
    return %c0_i32, %c0_i32_0 : i32, i32
  }
  func.func @transform_2(%arg0: i32, %arg1: i32) -> (i32, i32) {
    %c0_i32 = arith.constant 0 : i32
    %c0_i32_0 = arith.constant 0 : i32
    %c0_i32_1 = arith.constant 0 : i32
    return %c0_i32, %c0_i32_0 : i32, i32
  }
  func.func @transform_3(%arg0: i32, %arg1: i32) -> (i32, i32) {
    %c0_i32 = arith.constant 0 : i32
    %c0_i32_0 = arith.constant 0 : i32
    return %c0_i32, %arg1 : i32, i32
  }
  func.func @transform_4(%arg0: i32, %arg1: i32) -> (i32, i32) {
    %c0_i32 = arith.constant 0 : i32
    %c0_i32_0 = arith.constant 0 : i32
    return %c0_i32, %arg1 : i32, i32
  }
  func.func @transform_5(%arg0: i32, %arg1: i32) -> (i32, i32) {
    %c0_i32 = arith.constant 0 : i32
    %c0_i32_0 = arith.constant 0 : i32
    return %arg1, %c0_i32 : i32, i32
  }
  func.func @transform_6(%arg0: i32, %arg1: i32) -> (i32, i32) {
    %c0_i32 = arith.constant 0 : i32
    %c0_i32_0 = arith.constant 0 : i32
    %c0_i32_1 = arith.constant 0 : i32
    return %c0_i32, %c0_i32_0 : i32, i32
  }
  func.func @transform_7(%arg0: i32, %arg1: i32) -> (i32, i32) {
    %c0_i32 = arith.constant 0 : i32
    %c0_i32_0 = arith.constant 0 : i32
    return %arg0, %c0_i32 : i32, i32
  }
}

</mosaic_0001>

<bundles_post_ra>
// kernel: _patch_mlp_call.1
= control target key start
LH: loop header
LB: loop body
LE: loop exit
PB: predicated region body
PF: predicated region fallthrough
CT: control target
= control target key end

     0   :  { %s1421_s0 = inlined_call_operand.hbm [shape: f32[32,32], index: 0, kind: input, shape index: {}]   ;;  %s1422_s1 = inlined_call_operand.vmem [shape: f32[1,32], index: 1, kind: input, shape index: {}]   ;;  %s1423_s2 = inlined_call_operand.vmem [shape: f32[1,32], index: 2, kind: input, shape index: {}]   ;;  %s1424_s3 = inlined_call_operand.hbm [shape: bf16[32,128], index: 3, kind: input, shape index: {}]   ;;  %s1425_s4 = inlined_call_operand.vmem [shape: f32[1,128], index: 4, kind: input, shape index: {}]   ;;  %s1426_s5 = inlined_call_operand.hbm [shape: bf16[128,128], index: 5, kind: input, shape index: {}]   ;;  %s1427_s6 = inlined_call_operand.vmem [shape: f32[1,128], index: 6, kind: input, shape index: {}]   ;;  %s1428_s7 = inlined_call_operand.hbm [shape: f32[32,128], index: 7, kind: output, shape index: {}]  }
   0x1   :  { %1432 = sst [smem:[#allocation17_spill]] %s1424_s3 }
   0x2   :  { %1433 = sst [smem:[#allocation18_spill]] %s1426_s5 }
   0x3   :  { %12 = vsyncpa [#allocation5], 0 }
   0x4   :  { %14 = vsyncpa [#allocation5 + $0x1], 0 }
   0x5   :  { %15 = vsyncpa [#allocation8], 0 }
   0x6   :  { %16 = vsyncpa [#allocation6], 0 }
   0x7   :  { %18 = vsyncpa [#allocation6 + $0x1], 0  ;;  %s1228_s24 = smov 0   ;;  %s1230_s25 = smov 0  }
   0x8   :  { %s1232_s26 = smov 0   ;;  %s1234_s27 = smov 0  }
   0x9   :  { %s1236_s28 = smov 0   ;;  %s1238_s29 = smov 0  }
   0xa LB: > { %1434 = sst [smem:[#allocation14_spill]] %s1157_s24  ;;  %s817_s30 = sadd.s32 4294967295, %s1177_s29   ;;  %s1177_s29 = sphi %s1238_s29, %s24_s29   ;;  %s1173_s28 = sphi %s1236_s28, %s1453_s28   ;;  %s1169_s27 = sphi %s1234_s27, %s1452_s27   ;;  %s1165_s26 = sphi %s1232_s26, %s1451_s26   ;;  %s1161_s25 = sphi %s1230_s25, %s1450_s25   ;;  %s1157_s24 = sphi %s1228_s24, %s1449_s24  }
   0xb   : > { %s818_s8 = sadd.s32 4294967294, %s1177_s29   ;;  %p56_p0 = scmp.ne.s32.totalorder %s1161_s25, %s1157_s24 }
   0xc   : > { %p1262_p1 = scmp.eq.s32.totalorder %s817_s30, 0  ;;  %p1266_p2 = scmp.eq.s32.totalorder %s817_s30, 1 }
   0xd   : > { %p227_p3 = scmp.eq.s32.totalorder %s818_s8, 1  ;;  %p819_p5 = scmp.ge.s32.totalorder %s1177_s29, 1 }
   0xe   : > { %p1272_p4 = por %p1262_p1, %p56_p0  ;;  %p234_p7 = scmp.lt.s32.totalorder %s1177_s29, 3 }
   0xf   : > { %p1277_p6 = por %p227_p3, %p56_p0  ;;  %s1440_s3 = sld [smem:[#allocation17_spill]] }
  0x10   : > { %p1285_p8 = pnand %p819_p5, %p234_p7  ;;  %s1179_s17 = smov [#allocation7]  }
  0x11   : > { %s1438_s12 = scalar_select %p1277_p6, 1, 0 }
  0x12   : > { %p909_p9 = pneg %p1285_p8  ;;  %s255_s18 = sshll.u32 %s1179_s17, 4  ;;  %s256_s18 = int_to_ptr.vmem [resolvable:$true] %s255_s18 }
  0x13   : > { %1439 = sst [smem:[#allocation15_spill]] %s1438_s12  ;;  %p823_p11 = scmp.ge.s32.totalorder %s1177_s29, 2 }
  0x14   : > { %p910_p10 = pnand %p909_p9, %p1262_p1  ;;  %s1442_s5 = sld [smem:[#allocation18_spill]] }
  0x15   : > { %s253_s15 = sshll.u32 %s1440_s3, 4  ;;  %s1180_s22 = smov 64   ;;  %s254_s15 = int_to_ptr.hbm [resolvable:$true] %s253_s15 }
  0x16   : > { %s1181_s23 = smov 4   ;;  %s1182_s30 = smov [#allocation9]  }
  0x17   : > { %912 = dma.hbm_to_vmem [thread:$0]  (!%p910_p10), %s254_s15, 256, %s256_s18, [#allocation8], %s1180_s22, %s1180_s22, %s1181_s23  }
  0x18   : > { %s278_s8 = sshll.u32 %s1182_s30, 4  ;;  %s36_s13 = sadd.s32 1, %s1173_s28  ;;  %s279_s8 = int_to_ptr.vmem [resolvable:$true] %s278_s8 }
  0x19   : > { %s43_s14 = sadd.s32 1, %s1165_s26  ;;  %p38_p12 = scmp.ge.s32.totalorder %s36_s13, 2 }
  0x1a   : > { %s276_s21 = sshll.u32 %s1442_s5, 4  ;;  %p50_p13 = scmp.ne.s32.totalorder %s1165_s26, %s1161_s25  ;;  %s277_s21 = int_to_ptr.hbm [resolvable:$true] %s276_s21 }
  0x1b   : > { %915 = dma.hbm_to_vmem [thread:$0]  (!%p910_p10), %s277_s21, 1024, %s279_s8, [#allocation8], %s1180_s22, %s1180_s22, %s1181_s23  }
  0x1c   : > { %p51_p0 = scmp.eq.s32.totalorder %s1177_s29, 0  ;;  %p926_p3 = scmp.lt.s32.totalorder %s1177_s29, 2 }
  0x1d   : > { %s1455_s13 = smov (%p38_p12, %s36_s13), 0  ;;  %p1311_p7 = por %p1266_p2, %p50_p13 }
  0x1e   : > { %1443 = sst [smem:[#allocation16_spill]] %s1455_s13  ;;  %p1305_p5 = por %p51_p0, %p50_p13 }
  0x1f   : > { %s40_s18 = ssub.s32 %s1173_s28, %s1455_s13  ;;  %s295_s19 = sand.u32 1, %s1165_s26  }
  0x20   : > { %p41_p9 = scmp.eq.s32.totalorder %s40_s18, 0  ;;  %s824_s20 = sshll.u32 %s295_s19, 4 }
  0x21   : > { %s884_s21 = sshll.u32 %s1173_s28, 4  ;;  %s299_s5 = scalar_lea.vmem [#allocation4], %s824_s20 }
  0x22   : > { %s1320_s22 = scalar_select %p41_p9, %s1165_s26, %s43_s14  }
  0x23   : > { %s304_s8 = scalar_lea.hbm %s1421_s0, %s884_s21  ;;  %s307_s12 = sshll.u32 %s299_s5, 4  ;;  %s308_s12 = int_to_ptr.vmem [resolvable:$true] %s307_s12 }
  0x24   : > { %s305_s3 = sshll.u32 %s304_s8, 4  ;;  %p917_p2 = pnand %p926_p3, %p1305_p5  ;;  %s306_s3 = int_to_ptr.hbm [resolvable:$true] %s305_s3 }
  0x25   : > { %s296_s10 = scalar_lea.sflag [#allocation5], %s295_s19  ;;  %s1183_s13 = smov 128  }
  0x26   : > { %s1184_s24 = smov 8   ;;  %319 = sbr.rel (%p1285_p8) target bundleno = 662 (0x296), region = 48 }
  0x27   : > { %919 = dma.hbm_to_vmem [thread:$0]  (!%p917_p2), %s306_s3, 256, %s308_s12, %s296_s10, %s1183_s13, %s1183_s13, %s1184_s24  }
  0x28   : > { %s1332_s14 = sand.u32 (!%p1285_p8), 1, %s1161_s25  }
  0x29   : > { %s828_s5 = sshll.u32 (!%p1285_p8), %s1332_s14, 4  ;;  %s322_s18 = scalar_lea.sflag (!%p1285_p8), [#allocation5], %s1332_s14 }
  0x2a   : > { %s325_s17 = scalar_lea.vmem (!%p1285_p8), [#allocation4], %s828_s5 }
  0x2b   : > { %1144 = dma.done.wait (%p1272_p4), %s322_s18, 256  }
  0x2c   : > { %1146 = vsyncadd (%p1272_p4), %s322_s18, 4294967040 }
  0x2d   : > { %1148 = dma.done.wait (%p1262_p1), [#allocation8], 1280  }
  0x2e   : > { %1150 = vsyncadd (%p1262_p1), [#allocation8], 4294966016  ;;  %vm383_vm0 = vcmask 261120   ;;  %v381_v0 = vld [vmem:[%s325_s17] sm:$0xff]  ;;  %v382_v2 = vld [vmem:[%s325_s17 + $0x8] sm:$0xff]  ;;  %v1185_v4 = vmov 32.0  }
  0x2f   : > { %v384_v1 = vsel %vm383_vm0, %v381_v0, 0.0  ;;  %v387_v3 = vsel %vm383_vm0, %v382_v2, 0.0  ;;  %991 = vrcp.f32 %v1185_v4  ;;  %v887_v24 = vld [vmem:[#allocation7 + $0x8] sm:$0xff]  ;;  %v886_v27 = vld [vmem:[#allocation7] sm:$0xff]  ;;  %v987_v37 = vld [vmem:[%s1422_s1] ss:$0 sm:$0xff] }
  0x30   : > { %385 = vadd.xlane.f32.xlu0 %v384_v1  ;;  %491 = vmatpush.bf16.msra.mxu0 %v887_v24  ;;  %v988_v40 = vld [vmem:[%s1423_s2] ss:$0 sm:$0xff]  ;;  %vm449_vm6 = vcmask 257024   ;;  %v895_v55 = vld [vmem:[#allocation9 + $0x38] sm:$0xff]  ;;  %v894_v59 = vld [vmem:[#allocation9 + $0x30] sm:$0xff]  ;;  %s896_s20 = sshll.u32 %s1169_s27, 4 }
  0x31   : > { %v989_v54 = vld [vmem:[%s1425_s4] ss:$0 sm:$0xff]  ;;  %654 = vmatpush.bf16.msra.mxu1 %v895_v55  ;;  %s697_s30 = scalar_lea.hbm %s1428_s7, %s896_s20  ;;  %s369_s8 = scalar_lea.vmem [#allocation10], %s828_s5 }
  0x32   : > { %v893_v61 = vld [vmem:[#allocation9 + $0x28] sm:$0xff]  ;;  %s698_s10 = sshll.u32 %s369_s8, 4  ;;  %s700_s18 = sshll.u32 %s697_s30, 4  ;;  %s699_s10 = int_to_ptr.vmem [resolvable:$true] %s698_s10  ;;  %s701_s18 = int_to_ptr.hbm [resolvable:$true] %s700_s18 }
  0x33   : > { %s686_s17 = scalar_lea.sflag [#allocation6], %s1332_s14  ;;  %s1105_s3 = sshra.s32 %s701_s18, 4  ;;  %s1106_s3 = int_to_ptr.hbm [resolvable:$true] %s1105_s3 }
  0x34   : > { %492 = vmatpush.bf16.msra.mxu0 %v886_v27  ;;  %s1107_s27 = scalar_lea.hbm %s1106_s3, 16  ;;  %s1111_s5 = scalar_lea.hbm %s1428_s7, 32 }
  0x35   : > { %v992_v5 = vpop.eup %991  ;;  %655 = vmatpush.bf16.msra.mxu1 %v894_v59  ;;  %p1108_p1 = scmp.ne.s32.totalorder %s1106_s3, %s1107_s27  ;;  %p1112_p10 = scmp.lt.s32.totalorder %s1106_s3, %s1428_s7 }
  0x36   : > { %v391_v6 = vmul.f32 32.0, %v992_v5  ;;  %vm395_vm1 = vweird.f32 %v992_v5  ;;  %p1113_p12 = scmp.lt.s32.totalorder %s1111_s5, %s1107_s27 }
  0x37   : > { %p1109_p4 = pnand %p1108_p1, %p1311_p7 }
  0x38   : > { %388 = vadd.xlane.f32.xlu0 %v387_v3  ;;  %v392_v7 = vsub.f32 1.0, %v391_v6  ;;  %p1114_p13 = por %p1113_p12, %p1112_p10 }
  0x39   : > { %656 = vmatpush.bf16.msra.mxu1 %v893_v61  ;;  %p1110_p8 = pneg %p1109_p4 }
  0x3a   : > { %v393_v8 = vmul.f32 %v992_v5, %v392_v7 }
  0x3b   : > { %p1115_p0 = pnand %p1114_p13, %p1110_p8 }
  0x3c   : > { %v394_v9 = vadd.f32 %v992_v5, %v393_v8  ;;  %v891_v8 = vld [vmem:[#allocation9 + $0x18] sm:$0xff] }
  0x3e   : > { %v396_v10 = vsel %vm395_vm1, %v992_v5, %v394_v9 }
  0xa3   : > { %v386_v11 = vpop.xlane.xlu0 %385 }
  0xa4   : > { %v397_v12 = vmul.f32 %v396_v10, %v386_v11 }
  0xa6   : > { %v399_v13 = vsub.f32 %v381_v0, %v397_v12 }
  0xa8   : > { %v401_v14 = vmul.f32 %v399_v13, %v399_v13 }
  0xaa   : > { %v403_v15 = vsel %vm383_vm0, %v401_v14, 0.0  ;;  %v890_v14 = vld [vmem:[#allocation9 + $0x10] sm:$0xff] }
  0xab   : > { %404 = vadd.xlane.f32.xlu1 %v403_v15  ;;  %v389_v16 = vpop.xlane.xlu0 %388 }
  0xac   : > { %v398_v17 = vmul.f32 %v396_v10, %v389_v16 }
  0xae   : > { %v400_v18 = vsub.f32 %v382_v2, %v398_v17  ;;  %v892_v2 = vld [vmem:[#allocation9 + $0x20] sm:$0xff] }
  0xaf   : > { %657 = vmatpush.bf16.msra.mxu1 %v892_v2 }
  0xb0   : > { %v402_v19 = vmul.f32 %v400_v18, %v400_v18 }
  0xb2   : > { %v406_v20 = vsel %vm383_vm0, %v402_v19, 0.0 }
  0xb3   : > { %407 = vadd.xlane.f32.xlu1 %v406_v20  ;;  %658 = vmatpush.bf16.msra.mxu1 %v891_v8 }
  0xb7   : > { %659 = vmatpush.bf16.msra.mxu1 %v890_v14 }
 0x11e   : > { %v405_v21 = vpop.xlane.xlu1 %404 }
 0x11f   : > { %v409_v22 = vmul.f32 %v405_v21, %v396_v10 }
 0x121   : > { %v411_v23 = vadd.f32 1e-05, %v409_v22  ;;  %v889_v22 = vld [vmem:[#allocation9 + $0x8] sm:$0xff] }
 0x122   : > { %660 = vmatpush.bf16.msra.mxu1 %v889_v22 }
 0x123   : > { %993 = vrsqrt.f32 %v411_v23  ;;  %vm419_vm3 = vweird.f32 %v411_v23 }
 0x126   : > { %v408_v25 = vpop.xlane.xlu1 %407 }
 0x127   : > { %v410_v26 = vmul.f32 %v408_v25, %v396_v10 }
 0x129   : > { %v994_v28 = vpop.eup %993  ;;  %v412_v29 = vadd.f32 1e-05, %v410_v26 }
 0x12a   : > { %v414_v30 = vmul.f32 %v994_v28, %v411_v23  ;;  %vm420_vm2 = vweird.f32 %v994_v28 }
 0x12b   : > { %995 = vrsqrt.f32 %v412_v29  ;;  %vm421_vm4 = vmor %vm419_vm3, %vm420_vm2  ;;  %vm429_vm7 = vweird.f32 %v412_v29 }
 0x12c   : > { %v415_v31 = vmul.f32 %v994_v28, %v414_v30 }
 0x12e   : > { %v416_v32 = vmul.f32 0.5, %v415_v31 }
 0x130   : > { %v417_v33 = vsub.f32 1.5, %v416_v32 }
 0x131   : > { %v996_v34 = vpop.eup %995 }
 0x132   : > { %v418_v35 = vmul.f32 %v994_v28, %v417_v33  ;;  %v424_v36 = vmul.f32 %v996_v34, %v412_v29  ;;  %vm430_vm5 = vweird.f32 %v996_v34  ;;  %v888_v29 = vld [vmem:[#allocation9] sm:$0xff] }
 0x133   : > { %vm431_vm8 = vmor %vm429_vm7, %vm430_vm5  ;;  %661 = vmatpush.bf16.msra.mxu1 %v888_v29 }
 0x134   : > { %v422_v38 = vsel %vm421_vm4, %v994_v28, %v418_v35  ;;  %v425_v39 = vmul.f32 %v996_v34, %v424_v36 }
 0x135   : > { %v433_v41 = vmul.f32 %v422_v38, %v399_v13 }
 0x136   : > { %v426_v42 = vmul.f32 0.5, %v425_v39 }
 0x137   : > { %v439_v43 = vmul.f32 %v987_v37, %v433_v41 }
 0x138   : > { %v427_v44 = vsub.f32 1.5, %v426_v42 }
 0x139   : > { %v445_v45 = vadd.f32 %v988_v40, %v439_v43 }
 0x13a   : > { %v428_v46 = vmul.f32 %v996_v34, %v427_v44 }
 0x13b   : > { %v447_v47 = vpack.c.bf16 %v445_v45, %v445_v45 }
 0x13c   : > { %v432_v48 = vsel %vm431_vm8, %v996_v34, %v428_v46 }
 0x13d   : > { %450 = vst.msk [vmem:[#allocation2] sm:$0xf] %vm449_vm6, %v447_v47  ;;  %v434_v49 = vmul.f32 %v432_v48, %v400_v18 }
 0x13f   : > { %v440_v50 = vmul.f32 %v987_v37, %v434_v49 }
 0x141   : > { %v446_v51 = vadd.f32 %v988_v40, %v440_v50 }
 0x143   : > { %v448_v52 = vpack.c.bf16 %v446_v51, %v446_v51 }
 0x145   : > { %451 = vst.msk [vmem:[#allocation2 + $0x4] sm:$0xf] %vm449_vm6, %v448_v52 }
 0x14c   : > { %v885_v53 = vld [vmem:[#allocation2] sm:$0xff] }
 0x14d   : > { %844 = vmatmul.msk.bf16.vlgmr.msra.gmra.mxu0 %vm383_vm0, %v885_v53 }
 0x1ca   : > { %v494_v56 = vpop.f32.mrf.mxu0 }
 0x1cb   : > { %v1360_v57 = vadd.f32 %v989_v54, %v494_v56 }
 0x1cd   : > { %v1363_v58 = vmul.f32 0.70710677, %v1360_v57 }
 0x1cf   : > { %v503_v60 = vmul.f32 %v1363_v58, %v1363_v58 }
 0x1d1   : > { %v504_v62 = vmin.f32 %v503_v60, 16.0 }
 0x1d2   : > { %v496_v63 = vpop.f32.mrf.mxu0 }
 0x1d3   : > { %v505_v0 = vmul.f32 2.1237322e-06, %v504_v62  ;;  %v1367_v1 = vadd.f32 %v989_v54, %v496_v63  ;;  %v516_v3 = vmul.f32 3.8918573e-05, %v504_v62 }
 0x1d5   : > { %v506_v4 = vadd.f32 0.00028619796, %v505_v0  ;;  %v1370_v5 = vmul.f32 0.70710677, %v1367_v1  ;;  %v517_v6 = vadd.f32 0.001143296, %v516_v3 }
 0x1d7   : > { %v543_v7 = vmul.f32 %v1370_v5, %v1370_v5  ;;  %v507_v9 = vmul.f32 %v506_v4, %v504_v62  ;;  %v518_v10 = vmul.f32 %v517_v6, %v504_v62 }
 0x1d9   : > { %v544_v11 = vmin.f32 %v543_v7, 16.0  ;;  %v519_v12 = vadd.f32 0.014752088, %v518_v10  ;;  %v508_v16 = vadd.f32 0.0036580483, %v507_v9 }
 0x1db   : > { %v545_v13 = vmul.f32 2.1237322e-06, %v544_v11  ;;  %v556_v15 = vmul.f32 3.8918573e-05, %v544_v11  ;;  %v520_v17 = vmul.f32 %v519_v12, %v504_v62  ;;  %v509_v24 = vmul.f32 %v508_v16, %v504_v62 }
 0x1dc   : > { %v500_v16 = vmul.f32 0.5, %v1367_v1 }
 0x1dd   : > { %v546_v18 = vadd.f32 0.00028619796, %v545_v13  ;;  %v557_v19 = vadd.f32 0.001143296, %v556_v15  ;;  %v521_v20 = vadd.f32 0.112945676, %v520_v17 }
 0x1de   : > { %v510_v31 = vadd.f32 0.05243302, %v509_v24  ;;  %v499_v15 = vmul.f32 0.5, %v1360_v57 }
 0x1df   : > { %v547_v21 = vmul.f32 %v546_v18, %v544_v11  ;;  %v558_v23 = vmul.f32 %v557_v19, %v544_v11  ;;  %v522_v25 = vmul.f32 %v521_v20, %v504_v62 }
 0x1e0   : > { %v511_v37 = vmul.f32 %v510_v31, %v504_v62 }
 0x1e1   : > { %v548_v26 = vadd.f32 0.0036580483, %v547_v21  ;;  %v559_v27 = vadd.f32 0.014752088, %v558_v23  ;;  %v523_v28 = vadd.f32 0.4994258, %v522_v25 }
 0x1e2   : > { %v512_v41 = vadd.f32 0.18741608, %v511_v37 }
 0x1e3   : > { %v560_v30 = vmul.f32 %v559_v27, %v544_v11  ;;  %v524_v32 = vmul.f32 %v523_v28, %v504_v62  ;;  %v549_v33 = vmul.f32 %v548_v26, %v544_v11 }
 0x1e4   : > { %v513_v46 = vmul.f32 %v512_v41, %v504_v62 }
 0x1e5   : > { %v561_v34 = vadd.f32 0.112945676, %v560_v30  ;;  %v525_v35 = vadd.f32 1.0, %v524_v32  ;;  %v550_v38 = vadd.f32 0.05243302, %v549_v33 }
 0x1e6   : > { %v514_v52 = vadd.f32 1.1283791, %v513_v46 }
 0x1e7   : > { %v562_v36 = vmul.f32 %v561_v34, %v544_v11  ;;  %997 = vrcp.f32 %v525_v35  ;;  %v551_v42 = vmul.f32 %v550_v38, %v544_v11  ;;  %v537_v49 = vand.u32 2147483648, %v525_v35 }
 0x1e8   : > { %v535_v51 = vand.u32 2147483647, %v525_v35  ;;  %vm531_vm10 = vweird.f32 %v525_v35  ;;  %v515_v61 = vmul.f32 %v514_v52, %v1363_v58 }
 0x1e9   : > { %v563_v39 = vadd.f32 0.4994258, %v562_v36  ;;  %v552_v47 = vadd.f32 0.18741608, %v551_v42  ;;  %v538_v56 = vor.u32 1.1754944e-38, %v537_v49 }
 0x1ea   : > { %vm536_vm12 = vcmp.eq.f32.partialorder %v535_v51, 8.507059e+37 }
 0x1eb   : > { %v564_v40 = vmul.f32 %v563_v39, %v544_v11  ;;  %v553_v54 = vmul.f32 %v552_v47, %v544_v11 }
 0x1ed   : > { %v565_v43 = vadd.f32 1.0, %v564_v40  ;;  %v998_v44 = vpop.eup %997  ;;  %v554_v0 = vadd.f32 1.1283791, %v553_v54 }
 0x1ee   : > { %v527_v45 = vmul.f32 %v998_v44, %v525_v35  ;;  %vm532_vm9 = vweird.f32 %v998_v44 }
 0x1ef   : > { %999 = vrcp.f32 %v565_v43  ;;  %vm533_vm11 = vmor %vm531_vm10, %vm532_vm9  ;;  %v577_v2 = vand.u32 2147483648, %v565_v43  ;;  %v575_v6 = vand.u32 2147483647, %v565_v43  ;;  %vm571_vm14 = vweird.f32 %v565_v43 }
 0x1f0   : > { %v528_v48 = vsub.f32 1.0, %v527_v45  ;;  %v555_v9 = vmul.f32 %v554_v0, %v1370_v5  ;;  %v990_v5 = vld [vmem:[%s1427_s6] ss:$0 sm:$0xff] }
 0x1f1   : > { %v578_v8 = vor.u32 1.1754944e-38, %v577_v2  ;;  %vm576_vm0 = vcmp.eq.f32.partialorder %v575_v6, 8.507059e+37 }
 0x1f2   : > { %v529_v50 = vmul.f32 %v998_v44, %v528_v48 }
 0x1f4   : > { %v530_v55 = vadd.f32 %v998_v44, %v529_v50 }
 0x1f5   : > { %v1000_v53 = vpop.eup %999 }
 0x1f6   : > { %v567_v59 = vmul.f32 %v1000_v53, %v565_v43  ;;  %v534_v60 = vsel %vm533_vm11, %v998_v44, %v530_v55  ;;  %vm572_vm13 = vweird.f32 %v1000_v53 }
 0x1f7   : > { %v539_v63 = vsel %vm536_vm12, %v538_v56, %v534_v60  ;;  %vm573_vm15 = vmor %vm571_vm14, %vm572_vm13 }
 0x1f8   : > { %v568_v62 = vsub.f32 1.0, %v567_v59  ;;  %v540_v3 = vmul.f32 %v539_v63, %v515_v61 }
 0x1fa   : > { %v569_v4 = vmul.f32 %v1000_v53, %v568_v62  ;;  %v845_v10 = vclamps-f32 %v540_v3, 1.0 }
 0x1fc   : > { %v570_v7 = vadd.f32 %v1000_v53, %v569_v4  ;;  %v583_v14 = vadd.f32 1.0, %v845_v10 }
 0x1fe   : > { %v574_v11 = vsel %vm573_vm15, %v1000_v53, %v570_v7  ;;  %v585_v18 = vmul.f32 %v583_v14, %v499_v15 }
 0x1ff   : > { %v579_v12 = vsel %vm576_vm0, %v578_v8, %v574_v11 }
 0x200   : > { %v580_v58 = vmul.f32 %v579_v12, %v555_v9 }
 0x202   : > { %v846_v13 = vclamps-f32 %v580_v58, 1.0 }
 0x204   : > { %v584_v17 = vadd.f32 1.0, %v846_v13 }
 0x206   : > { %v586_v19 = vmul.f32 %v584_v17, %v500_v16 }
 0x208   : > { %v589_v20 = vpack.c.bf16 %v586_v19, %v585_v18 }
 0x20a   : > { %662 = vmatmul.bf16.vlgmr.msra.gmra.mxu1 %v589_v20 }
 0x287   : > { %v663_v21 = vpop.f32.mrf.mxu1 }
 0x288   : > { %v681_v22 = vadd.f32 %v990_v5, %v663_v21 }
 0x28a   : > { %683 = vst [vmem:[%s369_s8] sm:$0xff] %v681_v22 }
 0x28f   : > { %v665_v57 = vpop.f32.mrf.mxu1 }
 0x290   : > { %v682_v1 = vadd.f32 %v990_v5, %v665_v57 }
 0x292   : > { %684 = vst [vmem:[%s369_s8 + $0x8] sm:$0xff] %v682_v1 }
 0x293   : > { %1118 = shalt.err (!%p1115_p0)
}
 0x294   : > { %s1186_s14 = smov 128   ;;  %s1187_s16 = smov 8  }
 0x295   : > { %907 = dma.vmem_to_hbm [thread:$0]  (%p1311_p7), %s699_s10, 256, %s701_s18, %s686_s17, %s1186_s14, %s1186_s14, %s1187_s16  }
 0x296 PF: > { %s1446_s13 = sld [smem:[#allocation14_spill]]  ;;  %p921_p3 = pnand %p823_p11, %p1277_p6 }
 0x298   : > { %p922_p5 = pneg %p921_p3 }
 0x29c   : > { %s715_s20 = sand.u32 1, %s1446_s13  }
 0x29d   : > { %s716_s21 = scalar_lea.sflag [#allocation6], %s715_s20 }
 0x29e   : > { %1152 = dma.done.wait (%p922_p5), %s716_s21, 256  }
 0x29f   : > { %1154 = vsyncadd (%p922_p5), %s716_s21, 4294967040  ;;  %s24_s29 = sadd.s32 1, %s1177_s29   ;;  %s1448_s15 = sld [smem:[#allocation16_spill]] }
 0x2a0   : > { %p21_p9 = scmp.ge.s32.totalorder %s24_s29, 4   ;;  %s1449_s24 = smov %s1161_s25 }
 0x2a1   : > { %s1450_s25 = smov %s1165_s26  ;;  %s1451_s26 = smov %s1320_s22 }
 0x2a2   : > { %s1452_s27 = smov %s1173_s28  ;;  %23 = sbr.rel (!%p21_p9) target bundleno = 10 (0xa), region = 114 }
 0x2a5   : > { %s1453_s28 = smov %s1448_s15 }
 0x2a7   :  { %722 = vsyncpa [#allocation5], 1 }
 0x2a8   :  { %724 = vsyncpa [#allocation5 + $0x1], 1 }
 0x2a9   :  { %725 = vsyncpa [#allocation8], 1 }
 0x2aa   :  { %726 = vsyncpa [#allocation6], 1 }
 0x2ab   :  { %728 = vsyncpa [#allocation6 + $0x1], 1 }

</bundles_post_ra>
